<compile_context>
chip_gen: v6e
topology: v6e:2x2x1
jax: 0.10.0
libtpu: 0.0.40
codegen_flags: <defaults>
</compile_context>

<pallas_src>
import functools
import math

import jax
import jax.numpy as jnp
from jax.experimental import pallas as pl
from jax.experimental.pallas import tpu as pltpu


# --------------------------------------------------------------------------
# Fused kernel.  Grid = (batch, layer).  For a fixed batch element the layer
# axis runs sequentially and the activation is carried in out_ref (f32).
# --------------------------------------------------------------------------
def fused_block_kernel(
    stock_ref, future_ref,
    wq_ref, bq_ref, wkv_ref, bkv_ref, wo_ref, bo_ref,
    g1_ref, be1_ref,
    w1_ref, b1_ref, w2_ref, b2_ref,
    g2_ref, be2_ref,
    out_ref,
    ctx_scr,
    *, num_heads: int,
):
    layer = pl.program_id(1)

    # First layer of this batch element: seed the resident activation.
    @pl.when(layer == 0)
    def _():
        out_ref[...] = stock_ref[...].astype(jnp.float32)

    cdt = wq_ref.dtype                                   # MXU operand dtype
    approx = jnp.dtype(cdt) != jnp.dtype(jnp.float32)    # EUP approx recip ok for bf16

    x = out_ref[...]                                     # (Sq, H)  f32 resident
    f = future_ref[...]                                  # (Skv, H) f32

    Sq, H = x.shape
    hd = H // num_heads
    inv_scale = 1.0 / (float(hd) ** 0.5)
    eps = 1e-5

    # ---- projections (bf16 operands, f32 accumulation; K|V fused) ----
    q = jnp.dot(x.astype(cdt), wq_ref[0],
                preferred_element_type=jnp.float32) + bq_ref[0]          # (Sq, H)
    kv = jnp.dot(f.astype(cdt), wkv_ref[0],
                 preferred_element_type=jnp.float32) + bkv_ref[0]        # (Skv, 2H)
    k = kv[:, :H]
    v = kv[:, H:]

    # ---- per-head attention: correct FLOPs, no cross-batch mask ----
    for h in range(num_heads):                         # static unroll (nh small)
        lo = h * hd
        qh = (q[:, lo:lo + hd] * inv_scale).astype(cdt)                  # (Sq, hd)
        kh = k[:, lo:lo + hd].astype(cdt)                                # (Skv, hd)
        vh = v[:, lo:lo + hd].astype(cdt)                                # (Skv, hd)

        # scores = qh @ kh.T  (contract the hd dims; no explicit transpose)
        s = jax.lax.dot_general(qh, kh, (((1,), (1,)), ((), ())),
                                preferred_element_type=jnp.float32)      # (Sq, Skv)
        s = s - jnp.max(s, axis=-1, keepdims=True)
        p = jnp.exp(s)
        a = p * pl.reciprocal(jnp.sum(p, axis=-1, keepdims=True), approx=approx)

        ch = jnp.dot(a.astype(cdt), vh,
                     preferred_element_type=jnp.float32)                 # (Sq, hd)
        ctx_scr[:, lo:lo + hd] = ch

    attn_out = jnp.dot(ctx_scr[...].astype(cdt), wo_ref[0],
                       preferred_element_type=jnp.float32) + bo_ref[0]   # (Sq, H)

    # ---- residual + LayerNorm 1 (dropout = identity), all f32 ----
    h1 = x + attn_out
    mu1 = jnp.mean(h1, axis=-1, keepdims=True)
    var1 = jnp.mean((h1 - mu1) ** 2, axis=-1, keepdims=True)
    h1n = (h1 - mu1) * jax.lax.rsqrt(var1 + eps) * g1_ref[0] + be1_ref[0]

    # ---- feed-forward: Linear -> ReLU -> Linear ----
    ff = jnp.dot(h1n.astype(cdt), w1_ref[0],
                 preferred_element_type=jnp.float32) + b1_ref[0]
    ff = jnp.maximum(ff, 0.0)
    ff = jnp.dot(ff.astype(cdt), w2_ref[0],
                 preferred_element_type=jnp.float32) + b2_ref[0]

    # ---- residual + LayerNorm 2 ----
    h2 = h1n + ff
    mu2 = jnp.mean(h2, axis=-1, keepdims=True)
    var2 = jnp.mean((h2 - mu2) ** 2, axis=-1, keepdims=True)
    x_new = (h2 - mu2) * jax.lax.rsqrt(var2 + eps) * g2_ref[0] + be2_ref[0]

    # Carry to the next layer in the (f32) output block itself.
    out_ref[...] = x_new.astype(out_ref.dtype)


def transformer_encoder_d_pallas(stock, future, block_params, num_heads,
                                 *, compute_dtype=jnp.bfloat16):
    """All blocks of TransformerEncoderD in a single pallas_call."""
    B, Sq, H = stock.shape
    _, Skv, _ = future.shape
    L = len(block_params)
    F4 = block_params[0]["w1"].shape[1]

    stock2d = stock.reshape(B * Sq, H).astype(jnp.float32)
    future2d = future.reshape(B * Skv, H).astype(jnp.float32)

    def stack_w(name, tail_shape):
        return (jnp.stack([p[name] for p in block_params])
                .reshape((L,) + tail_shape).astype(compute_dtype))

    def stack_p(name, tail_shape):   # biases / LN params stay f32
        return (jnp.stack([p[name] for p in block_params])
                .reshape((L,) + tail_shape).astype(jnp.float32))

    wq = stack_w("wq", (H, H));     bq = stack_p("bq", (1, H))
    wkv = jnp.stack([jnp.concatenate([p["wk"], p["wv"]], axis=1)
                     for p in block_params]).astype(compute_dtype)       # (L, H, 2H)
    bkv = jnp.stack([jnp.concatenate([p["bk"], p["bv"]])
                     for p in block_params]).reshape(L, 1, 2 * H).astype(jnp.float32)
    wo = stack_w("wo", (H, H));     bo = stack_p("bo", (1, H))
    g1 = stack_p("ln1_g", (1, H));  be1 = stack_p("ln1_b", (1, H))
    w1 = stack_w("w1", (H, F4));    b1 = stack_p("b1", (1, F4))
    w2 = stack_w("w2", (F4, H));    b2 = stack_p("b2", (1, H))
    g2 = stack_p("ln2_g", (1, H));  be2 = stack_p("ln2_b", (1, H))

    def per_layer(r, c):
        # one layer's slice of a stacked (L, r, c) parameter, prefetched per l
        return pl.BlockSpec((1, r, c), lambda b, l: (l, 0, 0))

    in_specs = [
        pl.BlockSpec((Sq, H), lambda b, l: (b, 0)),      # stock (per batch element)
        pl.BlockSpec((Skv, H), lambda b, l: (b, 0)),     # future (resident over l)
        per_layer(H, H), per_layer(1, H),                # W_q, b_q
        per_layer(H, 2 * H), per_layer(1, 2 * H),        # W_kv, b_kv (fused K|V)
        per_layer(H, H), per_layer(1, H),                # W_o, b_o
        per_layer(1, H), per_layer(1, H),                # LN1 gamma, beta
        per_layer(H, F4), per_layer(1, F4),              # FF W1, b1
        per_layer(F4, H), per_layer(1, H),               # FF W2, b2
        per_layer(1, H), per_layer(1, H),                # LN2 gamma, beta
    ]

    kernel = functools.partial(fused_block_kernel, num_heads=num_heads)

    out2d = pl.pallas_call(
        kernel,
        out_shape=jax.ShapeDtypeStruct((B * Sq, H), jnp.float32),
        grid_spec=pltpu.PrefetchScalarGridSpec(
            num_scalar_prefetch=0,
            grid=(B, L),                                 # (row tiles, layers)
            in_specs=in_specs,
            out_specs=pl.BlockSpec((Sq, H), lambda b, l: (b, 0)),
            scratch_shapes=[pltpu.VMEM((Sq, H), jnp.float32)],   # per-step ctx buffer
        ),
        compiler_params=pltpu.CompilerParams(
            dimension_semantics=("parallel", "arbitrary"),       # megacore over batch
            vmem_limit_bytes=32 * 1024 * 1024),
    )(stock2d, future2d,
      wq, bq, wkv, bkv, wo, bo,
      g1, be1, w1, b1, w2, b2, g2, be2)

    return out2d.reshape(B, Sq, H).astype(stock.dtype)


# --------------------------------------------------------------------------
# Pure-JAX reference (mirrors the PyTorch forward) for correctness checking.
# --------------------------------------------------------------------------
def _ref_block(stock, future, p, num_heads):
    B, Sq, H = stock.shape
    Skv = future.shape[1]
    hd = H // num_heads
    q = stock @ p["wq"] + p["bq"]
    k = future @ p["wk"] + p["bk"]
    v = future @ p["wv"] + p["bv"]
    q = q.reshape(B, Sq, num_heads, hd).transpose(0, 2, 1, 3)
    k = k.reshape(B, Skv, num_heads, hd).transpose(0, 2, 1, 3)
    v = v.reshape(B, Skv, num_heads, hd).transpose(0, 2, 1, 3)
    scores = jnp.einsum("bnqd,bnkd->bnqk", q, k) / (hd ** 0.5)
    attn = jax.nn.softmax(scores, axis=-1)
    ctx = jnp.einsum("bnqk,bnkd->bnqd", attn, v)
    ctx = ctx.transpose(0, 2, 1, 3).reshape(B, Sq, H)
    attn_out = ctx @ p["wo"] + p["bo"]

    def ln(x, g, b):
        mu = jnp.mean(x, axis=-1, keepdims=True)
        var = jnp.mean((x - mu) ** 2, axis=-1, keepdims=True)
        return (x - mu) / jnp.sqrt(var + 1e-5) * g + b

    h1 = ln(stock + attn_out, p["ln1_g"], p["ln1_b"])
    ff = jnp.maximum(h1 @ p["w1"] + p["b1"], 0.0) @ p["w2"] + p["b2"]
    return ln(h1 + ff, p["ln2_g"], p["ln2_b"])


def _ref_encoder(stock, future, block_params, num_heads):
    for p in block_params:
        stock = _ref_block(stock, future, p, num_heads)
    return stock


# --------------------------------------------------------------------------
# Deterministic parameter init (PyTorch-Linear-style uniform bounds).
# --------------------------------------------------------------------------
def init_params(key, num_blocks, hidden_dim):
    def linear(key, fan_in, fan_out):
        kw, kb = jax.random.split(key)
        bound = 1.0 / math.sqrt(fan_in)
        w = jax.random.uniform(kw, (fan_in, fan_out), jnp.float32, -bound, bound)
        b = jax.random.uniform(kb, (fan_out,), jnp.float32, -bound, bound)
        return w, b

    params = []
    keys = jax.random.split(key, num_blocks)
    for blk_key in keys:
        ks = jax.random.split(blk_key, 6)
        wq, bq = linear(ks[0], hidden_dim, hidden_dim)
        wk, bkk = linear(ks[1], hidden_dim, hidden_dim)
        wv, bv = linear(ks[2], hidden_dim, hidden_dim)
        wo, bo = linear(ks[3], hidden_dim, hidden_dim)
        w1, b1 = linear(ks[4], hidden_dim, 4 * hidden_dim)
        w2, b2 = linear(ks[5], 4 * hidden_dim, hidden_dim)
        params.append(dict(
            wq=wq, bq=bq, wk=wk, bk=bkk, wv=wv, bv=bv, wo=wo, bo=bo,
            ln1_g=jnp.ones((hidden_dim,), jnp.float32),
            ln1_b=jnp.zeros((hidden_dim,), jnp.float32),
            w1=w1, b1=b1, w2=w2, b2=b2,
            ln2_g=jnp.ones((hidden_dim,), jnp.float32),
            ln2_b=jnp.zeros((hidden_dim,), jnp.float32),
        ))
    return params


if __name__ == "__main__":
    # Small config: num_blocks=2, hidden_dim=32, num_heads=4, dropout=0.0 (identity)
    num_blocks, hidden_dim, num_heads = 2, 32, 4
    B, S_q, S_kv = 2, 8, 8

    key = jax.random.PRNGKey(0)
    k_stock, k_future, k_params = jax.random.split(key, 3)
    stock = jax.random.normal(k_stock, (B, S_q, hidden_dim), jnp.float32)
    future = jax.random.normal(k_future, (B, S_kv, hidden_dim), jnp.float32)
    params = init_params(k_params, num_blocks, hidden_dim)

    ref = _ref_encoder(stock, future, params, num_heads)

    # Exact-precision path (f32 MXU operands): tight check against the f32 reference.
    out_f32 = transformer_encoder_d_pallas(stock, future, params, num_heads,
                                           compute_dtype=jnp.float32)
    out_f32 = jax.block_until_ready(out_f32)
    assert out_f32.shape == (B, S_q, hidden_dim)
    assert jnp.allclose(out_f32, ref, rtol=1e-4, atol=1e-4), (
        f"f32 max abs diff {jnp.max(jnp.abs(out_f32 - ref))}")

    # Optimized path (bf16 MXU operands, f32 accumulation / LN / softmax).
    out_bf16 = transformer_encoder_d_pallas(stock, future, params, num_heads,
                                            compute_dtype=jnp.bfloat16)
    out_bf16 = jax.block_until_ready(out_bf16)
    assert out_bf16.shape == (B, S_q, hidden_dim)
    assert jnp.allclose(out_bf16, ref, rtol=5e-2, atol=5e-2), (
        f"bf16 max abs diff {jnp.max(jnp.abs(out_bf16 - ref))}")

    print("KERNEL_OK")
</pallas_src>

<mosaic_0001>
module attributes {stable_mosaic.version = 11 : i64} {
  func.func @fused_block_kernel(%arg0: i32, %arg1: i32, %arg2: memref<8x32xf32, #tpu.memory_space<vmem>>, %arg3: memref<8x32xf32, #tpu.memory_space<vmem>>, %arg4: memref<1x32x32xf32, #tpu.memory_space<vmem>>, %arg5: memref<1x1x32xf32, #tpu.memory_space<vmem>>, %arg6: memref<1x32x64xf32, #tpu.memory_space<vmem>>, %arg7: memref<1x1x64xf32, #tpu.memory_space<vmem>>, %arg8: memref<1x32x32xf32, #tpu.memory_space<vmem>>, %arg9: memref<1x1x32xf32, #tpu.memory_space<vmem>>, %arg10: memref<1x1x32xf32, #tpu.memory_space<vmem>>, %arg11: memref<1x1x32xf32, #tpu.memory_space<vmem>>, %arg12: memref<1x32x128xf32, #tpu.memory_space<vmem>>, %arg13: memref<1x1x128xf32, #tpu.memory_space<vmem>>, %arg14: memref<1x128x32xf32, #tpu.memory_space<vmem>>, %arg15: memref<1x1x32xf32, #tpu.memory_space<vmem>>, %arg16: memref<1x1x32xf32, #tpu.memory_space<vmem>>, %arg17: memref<1x1x32xf32, #tpu.memory_space<vmem>>, %arg18: memref<8x32xf32, #tpu.memory_space<vmem>>, %arg19: memref<8x32xf32, #tpu.memory_space<vmem>>) attributes {dimension_semantics = [#tpu.dimension_semantics<parallel>, #tpu.dimension_semantics<arbitrary>], iteration_bounds = array<i64: 2, 2>, scalar_prefetch = 0 : i64, scratch_operands = 1 : i64, tpu.core_type = #tpu.core_type<tc>, window_params = [{transform_indices = @transform_0, window_bounds = array<i64: 8, 32>}, {transform_indices = @transform_1, window_bounds = array<i64: 8, 32>}, {transform_indices = @transform_2, window_bounds = array<i64: 1, 32, 32>}, {transform_indices = @transform_3, window_bounds = array<i64: 1, 1, 32>}, {transform_indices = @transform_4, window_bounds = array<i64: 1, 32, 64>}, {transform_indices = @transform_5, window_bounds = array<i64: 1, 1, 64>}, {transform_indices = @transform_6, window_bounds = array<i64: 1, 32, 32>}, {transform_indices = @transform_7, window_bounds = array<i64: 1, 1, 32>}, {transform_indices = @transform_8, window_bounds = array<i64: 1, 1, 32>}, {transform_indices = @transform_9, window_bounds = array<i64: 1, 1, 32>}, {transform_indices = @transform_10, window_bounds = array<i64: 1, 32, 128>}, {transform_indices = @transform_11, window_bounds = array<i64: 1, 1, 128>}, {transform_indices = @transform_12, window_bounds = array<i64: 1, 128, 32>}, {transform_indices = @transform_13, window_bounds = array<i64: 1, 1, 32>}, {transform_indices = @transform_14, window_bounds = array<i64: 1, 1, 32>}, {transform_indices = @transform_15, window_bounds = array<i64: 1, 1, 32>}, {transform_indices = @transform_16, window_bounds = array<i64: 8, 32>}]} {
    %c0_i32 = arith.constant 0 : i32
    %0 = arith.cmpi eq, %arg1, %c0_i32 : i32
    %1 = arith.extui %0 : i1 to i32
    %c0_i32_0 = arith.constant 0 : i32
    %2 = arith.cmpi ne, %1, %c0_i32_0 : i32
    scf.if %2 {
      %c0_90 = arith.constant 0 : index
      %c0_91 = arith.constant 0 : index
      %172 = vector.load %arg2[%c0_90, %c0_91] : memref<8x32xf32, #tpu.memory_space<vmem>>, vector<8x32xf32>
      %c0_92 = arith.constant 0 : index
      %c0_93 = arith.constant 0 : index
      %173 = vector.load %arg18[%c0_92, %c0_93] : memref<8x32xf32, #tpu.memory_space<vmem>>, vector<8x32xf32>
      tpu.vector_store %arg18[%c0_92, %c0_93], %172 {strides = array<i32>} : memref<8x32xf32, #tpu.memory_space<vmem>>, vector<8x32xf32>,
    } else {
    }
    %c0 = arith.constant 0 : index
    %c0_1 = arith.constant 0 : index
    %3 = vector.load %arg18[%c0, %c0_1] : memref<8x32xf32, #tpu.memory_space<vmem>>, vector<8x32xf32>
    %c0_2 = arith.constant 0 : index
    %c0_3 = arith.constant 0 : index
    %4 = vector.load %arg3[%c0_2, %c0_3] : memref<8x32xf32, #tpu.memory_space<vmem>>, vector<8x32xf32>
    %c0_4 = arith.constant 0 : index
    %c0_5 = arith.constant 0 : index
    %c0_6 = arith.constant 0 : index
    %5 = vector.load %arg4[%c0_4, %c0_5, %c0_6] : memref<1x32x32xf32, #tpu.memory_space<vmem>>, vector<1x32x32xf32>
    %6 = vector.shape_cast %5 : vector<1x32x32xf32> to vector<32x32xf32>
    %cst = arith.constant dense<0.000000e+00> : vector<8x32xf32>
    %7 = tpu.matmul %3, %6, %cst {dimension_numbers = #tpu.dot_dimension_numbers<[1], [0], [0], [1], [0, 0, 1, 1], [], []>} : vector<8x32xf32>, vector<32x32xf32>, vector<8x32xf32> -> vector<8x32xf32>
    %c0_7 = arith.constant 0 : index
    %c0_8 = arith.constant 0 : index
    %c0_9 = arith.constant 0 : index
    %8 = vector.load %arg5[%c0_7, %c0_8, %c0_9] : memref<1x1x32xf32, #tpu.memory_space<vmem>>, vector<1x1x32xf32>
    %9 = vector.shape_cast %8 : vector<1x1x32xf32> to vector<1x32xf32>
    %10 = vector.broadcast %9 : vector<1x32xf32> to vector<8x32xf32>
    %11 = arith.addf %7, %10 : vector<8x32xf32>
    %c0_10 = arith.constant 0 : index
    %c0_11 = arith.constant 0 : index
    %c0_12 = arith.constant 0 : index
    %12 = vector.load %arg6[%c0_10, %c0_11, %c0_12] : memref<1x32x64xf32, #tpu.memory_space<vmem>>, vector<1x32x64xf32>
    %13 = vector.shape_cast %12 : vector<1x32x64xf32> to vector<32x64xf32>
    %cst_13 = arith.constant dense<0.000000e+00> : vector<8x64xf32>
    %14 = tpu.matmul %4, %13, %cst_13 {dimension_numbers = #tpu.dot_dimension_numbers<[1], [0], [0], [1], [0, 0, 1, 1], [], []>} : vector<8x32xf32>, vector<32x64xf32>, vector<8x64xf32> -> vector<8x64xf32>
    %c0_14 = arith.constant 0 : index
    %c0_15 = arith.constant 0 : index
    %c0_16 = arith.constant 0 : index
    %15 = vector.load %arg7[%c0_14, %c0_15, %c0_16] : memref<1x1x64xf32, #tpu.memory_space<vmem>>, vector<1x1x64xf32>
    %16 = vector.shape_cast %15 : vector<1x1x64xf32> to vector<1x64xf32>
    %17 = vector.broadcast %16 : vector<1x64xf32> to vector<8x64xf32>
    %18 = arith.addf %14, %17 : vector<8x64xf32>
    %19 = vector.extract_strided_slice %18 {offsets = [0, 0], sizes = [8, 32], strides = [1, 1]} : vector<8x64xf32> to vector<8x32xf32>
    %20 = vector.extract_strided_slice %18 {offsets = [0, 32], sizes = [8, 32], strides = [1, 1]} : vector<8x64xf32> to vector<8x32xf32>
    %21 = vector.extract_strided_slice %11 {offsets = [0, 0], sizes = [8, 8], strides = [1, 1]} : vector<8x32xf32> to vector<8x8xf32>
    %cst_17 = arith.constant 0.353553385 : f32
    %22 = vector.broadcast %cst_17 : f32 to vector<8x8xf32>
    %23 = arith.mulf %21, %22 : vector<8x8xf32>
    %24 = vector.extract_strided_slice %19 {offsets = [0, 0], sizes = [8, 8], strides = [1, 1]} : vector<8x32xf32> to vector<8x8xf32>
    %25 = vector.extract_strided_slice %20 {offsets = [0, 0], sizes = [8, 8], strides = [1, 1]} : vector<8x32xf32> to vector<8x8xf32>
    %cst_18 = arith.constant dense<0.000000e+00> : vector<8x8xf32>
    %26 = tpu.matmul %23, %24, %cst_18 {dimension_numbers = #tpu.dot_dimension_numbers<[1], [1], [0], [0], [0, 0, 1, 0], [], []>} : vector<8x8xf32>, vector<8x8xf32>, vector<8x8xf32> -> vector<8x8xf32>
    %cst_19 = arith.constant dense<0xFF800000> : vector<8xf32>
    %27 = vector.multi_reduction <maximumf>, %26, %cst_19 [1] : vector<8x8xf32> to vector<8xf32>
    %28 = vector.shape_cast %27 : vector<8xf32> to vector<8x1xf32>
    %29 = vector.broadcast %28 : vector<8x1xf32> to vector<8x8xf32>
    %30 = arith.subf %26, %29 : vector<8x8xf32>
    %31 = math.exp %30 : vector<8x8xf32>
    %cst_20 = arith.constant dense<0.000000e+00> : vector<8xf32>
    %32 = vector.multi_reduction <add>, %31, %cst_20 [1] : vector<8x8xf32> to vector<8xf32>
    %33 = vector.shape_cast %32 : vector<8xf32> to vector<8x1xf32>
    %34 = tpu.reciprocal %33 : vector<8x1xf32> -> vector<8x1xf32>
    %35 = vector.broadcast %34 : vector<8x1xf32> to vector<8x8xf32>
    %36 = arith.mulf %31, %35 : vector<8x8xf32>
    %cst_21 = arith.constant dense<0.000000e+00> : vector<8x8xf32>
    %37 = tpu.matmul %36, %25, %cst_21 {dimension_numbers = #tpu.dot_dimension_numbers<[1], [0], [0], [1], [0, 0, 1, 1], [], []>} : vector<8x8xf32>, vector<8x8xf32>, vector<8x8xf32> -> vector<8x8xf32>
    %c0_22 = arith.constant 0 : index
    %c0_23 = arith.constant 0 : index
    %38 = vector.load %arg19[%c0_22, %c0_23] : memref<8x32xf32, #tpu.memory_space<vmem>>, vector<8x8xf32>
    tpu.vector_store %arg19[%c0_22, %c0_23], %37 {strides = array<i32>} : memref<8x32xf32, #tpu.memory_space<vmem>>, vector<8x8xf32>,
    %39 = vector.extract_strided_slice %11 {offsets = [0, 8], sizes = [8, 8], strides = [1, 1]} : vector<8x32xf32> to vector<8x8xf32>
    %cst_24 = arith.constant 0.353553385 : f32
    %40 = vector.broadcast %cst_24 : f32 to vector<8x8xf32>
    %41 = arith.mulf %39, %40 : vector<8x8xf32>
    %42 = vector.extract_strided_slice %19 {offsets = [0, 8], sizes = [8, 8], strides = [1, 1]} : vector<8x32xf32> to vector<8x8xf32>
    %43 = vector.extract_strided_slice %20 {offsets = [0, 8], sizes = [8, 8], strides = [1, 1]} : vector<8x32xf32> to vector<8x8xf32>
    %cst_25 = arith.constant dense<0.000000e+00> : vector<8x8xf32>
    %44 = tpu.matmul %41, %42, %cst_25 {dimension_numbers = #tpu.dot_dimension_numbers<[1], [1], [0], [0], [0, 0, 1, 0], [], []>} : vector<8x8xf32>, vector<8x8xf32>, vector<8x8xf32> -> vector<8x8xf32>
    %cst_26 = arith.constant dense<0xFF800000> : vector<8xf32>
    %45 = vector.multi_reduction <maximumf>, %44, %cst_26 [1] : vector<8x8xf32> to vector<8xf32>
    %46 = vector.shape_cast %45 : vector<8xf32> to vector<8x1xf32>
    %47 = vector.broadcast %46 : vector<8x1xf32> to vector<8x8xf32>
    %48 = arith.subf %44, %47 : vector<8x8xf32>
    %49 = math.exp %48 : vector<8x8xf32>
    %cst_27 = arith.constant dense<0.000000e+00> : vector<8xf32>
    %50 = vector.multi_reduction <add>, %49, %cst_27 [1] : vector<8x8xf32> to vector<8xf32>
    %51 = vector.shape_cast %50 : vector<8xf32> to vector<8x1xf32>
    %52 = tpu.reciprocal %51 : vector<8x1xf32> -> vector<8x1xf32>
    %53 = vector.broadcast %52 : vector<8x1xf32> to vector<8x8xf32>
    %54 = arith.mulf %49, %53 : vector<8x8xf32>
    %cst_28 = arith.constant dense<0.000000e+00> : vector<8x8xf32>
    %55 = tpu.matmul %54, %43, %cst_28 {dimension_numbers = #tpu.dot_dimension_numbers<[1], [0], [0], [1], [0, 0, 1, 1], [], []>} : vector<8x8xf32>, vector<8x8xf32>, vector<8x8xf32> -> vector<8x8xf32>
    %c0_29 = arith.constant 0 : index
    %c8 = arith.constant 8 : index
    %56 = vector.load %arg19[%c0_29, %c8] : memref<8x32xf32, #tpu.memory_space<vmem>>, vector<8x8xf32>
    tpu.vector_store %arg19[%c0_29, %c8], %55 {strides = array<i32>} : memref<8x32xf32, #tpu.memory_space<vmem>>, vector<8x8xf32>,
    %57 = vector.extract_strided_slice %11 {offsets = [0, 16], sizes = [8, 8], strides = [1, 1]} : vector<8x32xf32> to vector<8x8xf32>
    %cst_30 = arith.constant 0.353553385 : f32
    %58 = vector.broadcast %cst_30 : f32 to vector<8x8xf32>
    %59 = arith.mulf %57, %58 : vector<8x8xf32>
    %60 = vector.extract_strided_slice %19 {offsets = [0, 16], sizes = [8, 8], strides = [1, 1]} : vector<8x32xf32> to vector<8x8xf32>
    %61 = vector.extract_strided_slice %20 {offsets = [0, 16], sizes = [8, 8], strides = [1, 1]} : vector<8x32xf32> to vector<8x8xf32>
    %cst_31 = arith.constant dense<0.000000e+00> : vector<8x8xf32>
    %62 = tpu.matmul %59, %60, %cst_31 {dimension_numbers = #tpu.dot_dimension_numbers<[1], [1], [0], [0], [0, 0, 1, 0], [], []>} : vector<8x8xf32>, vector<8x8xf32>, vector<8x8xf32> -> vector<8x8xf32>
    %cst_32 = arith.constant dense<0xFF800000> : vector<8xf32>
    %63 = vector.multi_reduction <maximumf>, %62, %cst_32 [1] : vector<8x8xf32> to vector<8xf32>
    %64 = vector.shape_cast %63 : vector<8xf32> to vector<8x1xf32>
    %65 = vector.broadcast %64 : vector<8x1xf32> to vector<8x8xf32>
    %66 = arith.subf %62, %65 : vector<8x8xf32>
    %67 = math.exp %66 : vector<8x8xf32>
    %cst_33 = arith.constant dense<0.000000e+00> : vector<8xf32>
    %68 = vector.multi_reduction <add>, %67, %cst_33 [1] : vector<8x8xf32> to vector<8xf32>
    %69 = vector.shape_cast %68 : vector<8xf32> to vector<8x1xf32>
    %70 = tpu.reciprocal %69 : vector<8x1xf32> -> vector<8x1xf32>
    %71 = vector.broadcast %70 : vector<8x1xf32> to vector<8x8xf32>
    %72 = arith.mulf %67, %71 : vector<8x8xf32>
    %cst_34 = arith.constant dense<0.000000e+00> : vector<8x8xf32>
    %73 = tpu.matmul %72, %61, %cst_34 {dimension_numbers = #tpu.dot_dimension_numbers<[1], [0], [0], [1], [0, 0, 1, 1], [], []>} : vector<8x8xf32>, vector<8x8xf32>, vector<8x8xf32> -> vector<8x8xf32>
    %c0_35 = arith.constant 0 : index
    %c16 = arith.constant 16 : index
    %74 = vector.load %arg19[%c0_35, %c16] : memref<8x32xf32, #tpu.memory_space<vmem>>, vector<8x8xf32>
    tpu.vector_store %arg19[%c0_35, %c16], %73 {strides = array<i32>} : memref<8x32xf32, #tpu.memory_space<vmem>>, vector<8x8xf32>,
    %75 = vector.extract_strided_slice %11 {offsets = [0, 24], sizes = [8, 8], strides = [1, 1]} : vector<8x32xf32> to vector<8x8xf32>
    %cst_36 = arith.constant 0.353553385 : f32
    %76 = vector.broadcast %cst_36 : f32 to vector<8x8xf32>
    %77 = arith.mulf %75, %76 : vector<8x8xf32>
    %78 = vector.extract_strided_slice %19 {offsets = [0, 24], sizes = [8, 8], strides = [1, 1]} : vector<8x32xf32> to vector<8x8xf32>
    %79 = vector.extract_strided_slice %20 {offsets = [0, 24], sizes = [8, 8], strides = [1, 1]} : vector<8x32xf32> to vector<8x8xf32>
    %cst_37 = arith.constant dense<0.000000e+00> : vector<8x8xf32>
    %80 = tpu.matmul %77, %78, %cst_37 {dimension_numbers = #tpu.dot_dimension_numbers<[1], [1], [0], [0], [0, 0, 1, 0], [], []>} : vector<8x8xf32>, vector<8x8xf32>, vector<8x8xf32> -> vector<8x8xf32>
    %cst_38 = arith.constant dense<0xFF800000> : vector<8xf32>
    %81 = vector.multi_reduction <maximumf>, %80, %cst_38 [1] : vector<8x8xf32> to vector<8xf32>
    %82 = vector.shape_cast %81 : vector<8xf32> to vector<8x1xf32>
    %83 = vector.broadcast %82 : vector<8x1xf32> to vector<8x8xf32>
    %84 = arith.subf %80, %83 : vector<8x8xf32>
    %85 = math.exp %84 : vector<8x8xf32>
    %cst_39 = arith.constant dense<0.000000e+00> : vector<8xf32>
    %86 = vector.multi_reduction <add>, %85, %cst_39 [1] : vector<8x8xf32> to vector<8xf32>
    %87 = vector.shape_cast %86 : vector<8xf32> to vector<8x1xf32>
    %88 = tpu.reciprocal %87 : vector<8x1xf32> -> vector<8x1xf32>
    %89 = vector.broadcast %88 : vector<8x1xf32> to vector<8x8xf32>
    %90 = arith.mulf %85, %89 : vector<8x8xf32>
    %cst_40 = arith.constant dense<0.000000e+00> : vector<8x8xf32>
    %91 = tpu.matmul %90, %79, %cst_40 {dimension_numbers = #tpu.dot_dimension_numbers<[1], [0], [0], [1], [0, 0, 1, 1], [], []>} : vector<8x8xf32>, vector<8x8xf32>, vector<8x8xf32> -> vector<8x8xf32>
    %c0_41 = arith.constant 0 : index
    %c24 = arith.constant 24 : index
    %92 = vector.load %arg19[%c0_41, %c24] : memref<8x32xf32, #tpu.memory_space<vmem>>, vector<8x8xf32>
    tpu.vector_store %arg19[%c0_41, %c24], %91 {strides = array<i32>} : memref<8x32xf32, #tpu.memory_space<vmem>>, vector<8x8xf32>,
    %c0_42 = arith.constant 0 : index
    %c0_43 = arith.constant 0 : index
    %93 = vector.load %arg19[%c0_42, %c0_43] : memref<8x32xf32, #tpu.memory_space<vmem>>, vector<8x32xf32>
    %c0_44 = arith.constant 0 : index
    %c0_45 = arith.constant 0 : index
    %c0_46 = arith.constant 0 : index
    %94 = vector.load %arg8[%c0_44, %c0_45, %c0_46] : memref<1x32x32xf32, #tpu.memory_space<vmem>>, vector<1x32x32xf32>
    %95 = vector.shape_cast %94 : vector<1x32x32xf32> to vector<32x32xf32>
    %cst_47 = arith.constant dense<0.000000e+00> : vector<8x32xf32>
    %96 = tpu.matmul %93, %95, %cst_47 {dimension_numbers = #tpu.dot_dimension_numbers<[1], [0], [0], [1], [0, 0, 1, 1], [], []>} : vector<8x32xf32>, vector<32x32xf32>, vector<8x32xf32> -> vector<8x32xf32>
    %c0_48 = arith.constant 0 : index
    %c0_49 = arith.constant 0 : index
    %c0_50 = arith.constant 0 : index
    %97 = vector.load %arg9[%c0_48, %c0_49, %c0_50] : memref<1x1x32xf32, #tpu.memory_space<vmem>>, vector<1x1x32xf32>
    %98 = vector.shape_cast %97 : vector<1x1x32xf32> to vector<1x32xf32>
    %99 = vector.broadcast %98 : vector<1x32xf32> to vector<8x32xf32>
    %100 = arith.addf %96, %99 : vector<8x32xf32>
    %101 = arith.addf %3, %100 : vector<8x32xf32>
    %cst_51 = arith.constant dense<0.000000e+00> : vector<8xf32>
    %102 = vector.multi_reduction <add>, %101, %cst_51 [1] : vector<8x32xf32> to vector<8xf32>
    %103 = vector.shape_cast %102 : vector<8xf32> to vector<8x1xf32>
    %cst_52 = arith.constant 3.200000e+01 : f32
    %104 = vector.broadcast %cst_52 : f32 to vector<8x1xf32>
    %105 = arith.divf %103, %104 : vector<8x1xf32>
    %106 = vector.broadcast %105 : vector<8x1xf32> to vector<8x32xf32>
    %107 = arith.subf %101, %106 : vector<8x32xf32>
    %108 = arith.mulf %107, %107 : vector<8x32xf32>
    %cst_53 = arith.constant dense<0.000000e+00> : vector<8xf32>
    %109 = vector.multi_reduction <add>, %108, %cst_53 [1] : vector<8x32xf32> to vector<8xf32>
    %110 = vector.shape_cast %109 : vector<8xf32> to vector<8x1xf32>
    %cst_54 = arith.constant 3.200000e+01 : f32
    %111 = vector.broadcast %cst_54 : f32 to vector<8x1xf32>
    %112 = arith.divf %110, %111 : vector<8x1xf32>
    %113 = vector.broadcast %105 : vector<8x1xf32> to vector<8x32xf32>
    %114 = arith.subf %101, %113 : vector<8x32xf32>
    %cst_55 = arith.constant 9.99999974E-6 : f32
    %115 = vector.broadcast %cst_55 : f32 to vector<8x1xf32>
    %116 = arith.addf %112, %115 : vector<8x1xf32>
    %117 = math.rsqrt %116 : vector<8x1xf32>
    %118 = vector.broadcast %117 : vector<8x1xf32> to vector<8x32xf32>
    %119 = arith.mulf %114, %118 : vector<8x32xf32>
    %c0_56 = arith.constant 0 : index
    %c0_57 = arith.constant 0 : index
    %c0_58 = arith.constant 0 : index
    %120 = vector.load %arg10[%c0_56, %c0_57, %c0_58] : memref<1x1x32xf32, #tpu.memory_space<vmem>>, vector<1x1x32xf32>
    %121 = vector.shape_cast %120 : vector<1x1x32xf32> to vector<1x32xf32>
    %122 = vector.broadcast %121 : vector<1x32xf32> to vector<8x32xf32>
    %123 = arith.mulf %119, %122 : vector<8x32xf32>
    %c0_59 = arith.constant 0 : index
    %c0_60 = arith.constant 0 : index
    %c0_61 = arith.constant 0 : index
    %124 = vector.load %arg11[%c0_59, %c0_60, %c0_61] : memref<1x1x32xf32, #tpu.memory_space<vmem>>, vector<1x1x32xf32>
    %125 = vector.shape_cast %124 : vector<1x1x32xf32> to vector<1x32xf32>
    %126 = vector.broadcast %125 : vector<1x32xf32> to vector<8x32xf32>
    %127 = arith.addf %123, %126 : vector<8x32xf32>
    %c0_62 = arith.constant 0 : index
    %c0_63 = arith.constant 0 : index
    %c0_64 = arith.constant 0 : index
    %128 = vector.load %arg12[%c0_62, %c0_63, %c0_64] : memref<1x32x128xf32, #tpu.memory_space<vmem>>, vector<1x32x128xf32>
    %129 = vector.shape_cast %128 : vector<1x32x128xf32> to vector<32x128xf32>
    %cst_65 = arith.constant dense<0.000000e+00> : vector<8x128xf32>
    %130 = tpu.matmul %127, %129, %cst_65 {dimension_numbers = #tpu.dot_dimension_numbers<[1], [0], [0], [1], [0, 0, 1, 1], [], []>} : vector<8x32xf32>, vector<32x128xf32>, vector<8x128xf32> -> vector<8x128xf32>
    %c0_66 = arith.constant 0 : index
    %c0_67 = arith.constant 0 : index
    %c0_68 = arith.constant 0 : index
    %131 = vector.load %arg13[%c0_66, %c0_67, %c0_68] : memref<1x1x128xf32, #tpu.memory_space<vmem>>, vector<1x1x128xf32>
    %132 = vector.shape_cast %131 : vector<1x1x128xf32> to vector<1x128xf32>
    %133 = vector.broadcast %132 : vector<1x128xf32> to vector<8x128xf32>
    %134 = arith.addf %130, %133 : vector<8x128xf32>
    %cst_69 = arith.constant 0.000000e+00 : f32
    %135 = vector.broadcast %cst_69 : f32 to vector<8x128xf32>
    %136 = arith.maximumf %134, %135 : vector<8x128xf32>
    %c0_70 = arith.constant 0 : index
    %c0_71 = arith.constant 0 : index
    %c0_72 = arith.constant 0 : index
    %137 = vector.load %arg14[%c0_70, %c0_71, %c0_72] : memref<1x128x32xf32, #tpu.memory_space<vmem>>, vector<1x128x32xf32>
    %138 = vector.shape_cast %137 : vector<1x128x32xf32> to vector<128x32xf32>
    %cst_73 = arith.constant dense<0.000000e+00> : vector<8x32xf32>
    %139 = tpu.matmul %136, %138, %cst_73 {dimension_numbers = #tpu.dot_dimension_numbers<[1], [0], [0], [1], [0, 0, 1, 1], [], []>} : vector<8x128xf32>, vector<128x32xf32>, vector<8x32xf32> -> vector<8x32xf32>
    %c0_74 = arith.constant 0 : index
    %c0_75 = arith.constant 0 : index
    %c0_76 = arith.constant 0 : index
    %140 = vector.load %arg15[%c0_74, %c0_75, %c0_76] : memref<1x1x32xf32, #tpu.memory_space<vmem>>, vector<1x1x32xf32>
    %141 = vector.shape_cast %140 : vector<1x1x32xf32> to vector<1x32xf32>
    %142 = vector.broadcast %141 : vector<1x32xf32> to vector<8x32xf32>
    %143 = arith.addf %139, %142 : vector<8x32xf32>
    %144 = arith.addf %127, %143 : vector<8x32xf32>
    %cst_77 = arith.constant dense<0.000000e+00> : vector<8xf32>
    %145 = vector.multi_reduction <add>, %144, %cst_77 [1] : vector<8x32xf32> to vector<8xf32>
    %146 = vector.shape_cast %145 : vector<8xf32> to vector<8x1xf32>
    %cst_78 = arith.constant 3.200000e+01 : f32
    %147 = vector.broadcast %cst_78 : f32 to vector<8x1xf32>
    %148 = arith.divf %146, %147 : vector<8x1xf32>
    %149 = vector.broadcast %148 : vector<8x1xf32> to vector<8x32xf32>
    %150 = arith.subf %144, %149 : vector<8x32xf32>
    %151 = arith.mulf %150, %150 : vector<8x32xf32>
    %cst_79 = arith.constant dense<0.000000e+00> : vector<8xf32>
    %152 = vector.multi_reduction <add>, %151, %cst_79 [1] : vector<8x32xf32> to vector<8xf32>
    %153 = vector.shape_cast %152 : vector<8xf32> to vector<8x1xf32>
    %cst_80 = arith.constant 3.200000e+01 : f32
    %154 = vector.broadcast %cst_80 : f32 to vector<8x1xf32>
    %155 = arith.divf %153, %154 : vector<8x1xf32>
    %156 = vector.broadcast %148 : vector<8x1xf32> to vector<8x32xf32>
    %157 = arith.subf %144, %156 : vector<8x32xf32>
    %cst_81 = arith.constant 9.99999974E-6 : f32
    %158 = vector.broadcast %cst_81 : f32 to vector<8x1xf32>
    %159 = arith.addf %155, %158 : vector<8x1xf32>
    %160 = math.rsqrt %159 : vector<8x1xf32>
    %161 = vector.broadcast %160 : vector<8x1xf32> to vector<8x32xf32>
    %162 = arith.mulf %157, %161 : vector<8x32xf32>
    %c0_82 = arith.constant 0 : index
    %c0_83 = arith.constant 0 : index
    %c0_84 = arith.constant 0 : index
    %163 = vector.load %arg16[%c0_82, %c0_83, %c0_84] : memref<1x1x32xf32, #tpu.memory_space<vmem>>, vector<1x1x32xf32>
    %164 = vector.shape_cast %163 : vector<1x1x32xf32> to vector<1x32xf32>
    %165 = vector.broadcast %164 : vector<1x32xf32> to vector<8x32xf32>
    %166 = arith.mulf %162, %165 : vector<8x32xf32>
    %c0_85 = arith.constant 0 : index
    %c0_86 = arith.constant 0 : index
    %c0_87 = arith.constant 0 : index
    %167 = vector.load %arg17[%c0_85, %c0_86, %c0_87] : memref<1x1x32xf32, #tpu.memory_space<vmem>>, vector<1x1x32xf32>
    %168 = vector.shape_cast %167 : vector<1x1x32xf32> to vector<1x32xf32>
    %169 = vector.broadcast %168 : vector<1x32xf32> to vector<8x32xf32>
    %170 = arith.addf %166, %169 : vector<8x32xf32>
    %c0_88 = arith.constant 0 : index
    %c0_89 = arith.constant 0 : index
    %171 = vector.load %arg18[%c0_88, %c0_89] : memref<8x32xf32, #tpu.memory_space<vmem>>, vector<8x32xf32>
    tpu.vector_store %arg18[%c0_88, %c0_89], %170 {strides = array<i32>} : memref<8x32xf32, #tpu.memory_space<vmem>>, vector<8x32xf32>,
    return
  }
  func.func @transform_0(%arg0: i32, %arg1: i32) -> (i32, i32) {
    %c0_i32 = arith.constant 0 : i32
    %c0_i32_0 = arith.constant 0 : i32
    return %arg0, %c0_i32 : i32, i32
  }
  func.func @transform_1(%arg0: i32, %arg1: i32) -> (i32, i32) {
    %c0_i32 = arith.constant 0 : i32
    %c0_i32_0 = arith.constant 0 : i32
    return %arg0, %c0_i32 : i32, i32
  }
  func.func @transform_2(%arg0: i32, %arg1: i32) -> (i32, i32, i32) {
    %c0_i32 = arith.constant 0 : i32
    %c0_i32_0 = arith.constant 0 : i32
    %c0_i32_1 = arith.constant 0 : i32
    return %arg1, %c0_i32, %c0_i32_0 : i32, i32, i32
  }
  func.func @transform_3(%arg0: i32, %arg1: i32) -> (i32, i32, i32) {
    %c0_i32 = arith.constant 0 : i32
    %c0_i32_0 = arith.constant 0 : i32
    %c0_i32_1 = arith.constant 0 : i32
    return %arg1, %c0_i32, %c0_i32_0 : i32, i32, i32
  }
  func.func @transform_4(%arg0: i32, %arg1: i32) -> (i32, i32, i32) {
    %c0_i32 = arith.constant 0 : i32
    %c0_i32_0 = arith.constant 0 : i32
    %c0_i32_1 = arith.constant 0 : i32
    return %arg1, %c0_i32, %c0_i32_0 : i32, i32, i32
  }
  func.func @transform_5(%arg0: i32, %arg1: i32) -> (i32, i32, i32) {
    %c0_i32 = arith.constant 0 : i32
    %c0_i32_0 = arith.constant 0 : i32
    %c0_i32_1 = arith.constant 0 : i32
    return %arg1, %c0_i32, %c0_i32_0 : i32, i32, i32
  }
  func.func @transform_6(%arg0: i32, %arg1: i32) -> (i32, i32, i32) {
    %c0_i32 = arith.constant 0 : i32
    %c0_i32_0 = arith.constant 0 : i32
    %c0_i32_1 = arith.constant 0 : i32
    return %arg1, %c0_i32, %c0_i32_0 : i32, i32, i32
  }
  func.func @transform_7(%arg0: i32, %arg1: i32) -> (i32, i32, i32) {
    %c0_i32 = arith.constant 0 : i32
    %c0_i32_0 = arith.constant 0 : i32
    %c0_i32_1 = arith.constant 0 : i32
    return %arg1, %c0_i32, %c0_i32_0 : i32, i32, i32
  }
  func.func @transform_8(%arg0: i32, %arg1: i32) -> (i32, i32, i32) {
    %c0_i32 = arith.constant 0 : i32
    %c0_i32_0 = arith.constant 0 : i32
    %c0_i32_1 = arith.constant 0 : i32
    return %arg1, %c0_i32, %c0_i32_0 : i32, i32, i32
  }
  func.func @transform_9(%arg0: i32, %arg1: i32) -> (i32, i32, i32) {
    %c0_i32 = arith.constant 0 : i32
    %c0_i32_0 = arith.constant 0 : i32
    %c0_i32_1 = arith.constant 0 : i32
    return %arg1, %c0_i32, %c0_i32_0 : i32, i32, i32
  }
  func.func @transform_10(%arg0: i32, %arg1: i32) -> (i32, i32, i32) {
    %c0_i32 = arith.constant 0 : i32
    %c0_i32_0 = arith.constant 0 : i32
    %c0_i32_1 = arith.constant 0 : i32
    return %arg1, %c0_i32, %c0_i32_0 : i32, i32, i32
  }
  func.func @transform_11(%arg0: i32, %arg1: i32) -> (i32, i32, i32) {
    %c0_i32 = arith.constant 0 : i32
    %c0_i32_0 = arith.constant 0 : i32
    %c0_i32_1 = arith.constant 0 : i32
    return %arg1, %c0_i32, %c0_i32_0 : i32, i32, i32
  }
  func.func @transform_12(%arg0: i32, %arg1: i32) -> (i32, i32, i32) {
    %c0_i32 = arith.constant 0 : i32
    %c0_i32_0 = arith.constant 0 : i32
    %c0_i32_1 = arith.constant 0 : i32
    return %arg1, %c0_i32, %c0_i32_0 : i32, i32, i32
  }
  func.func @transform_13(%arg0: i32, %arg1: i32) -> (i32, i32, i32) {
    %c0_i32 = arith.constant 0 : i32
    %c0_i32_0 = arith.constant 0 : i32
    %c0_i32_1 = arith.constant 0 : i32
    return %arg1, %c0_i32, %c0_i32_0 : i32, i32, i32
  }
  func.func @transform_14(%arg0: i32, %arg1: i32) -> (i32, i32, i32) {
    %c0_i32 = arith.constant 0 : i32
    %c0_i32_0 = arith.constant 0 : i32
    %c0_i32_1 = arith.constant 0 : i32
    return %arg1, %c0_i32, %c0_i32_0 : i32, i32, i32
  }
  func.func @transform_15(%arg0: i32, %arg1: i32) -> (i32, i32, i32) {
    %c0_i32 = arith.constant 0 : i32
    %c0_i32_0 = arith.constant 0 : i32
    %c0_i32_1 = arith.constant 0 : i32
    return %arg1, %c0_i32, %c0_i32_0 : i32, i32, i32
  }
  func.func @transform_16(%arg0: i32, %arg1: i32) -> (i32, i32) {
    %c0_i32 = arith.constant 0 : i32
    %c0_i32_0 = arith.constant 0 : i32
    return %arg0, %c0_i32 : i32, i32
  }
}

</mosaic_0001>

<bundles_post_ra>
// kernel: tpu_custom_call.1
= control target key start
LH: loop header
LB: loop body
LE: loop exit
PB: predicated region body
PF: predicated region fallthrough
CT: control target
= control target key end

     0   :  { %s3101_s0 = inlined_call_operand.vmem [shape: f32[16,32], index: 0, kind: input, shape index: {}]   ;;  %s3102_s1 = inlined_call_operand.vmem [shape: f32[16,32], index: 1, kind: input, shape index: {}]   ;;  %s3103_s2 = inlined_call_operand.vmem [shape: f32[2,32,32], index: 2, kind: input, shape index: {}]   ;;  %s3104_s3 = inlined_call_operand.vmem [shape: f32[2,1,32], index: 3, kind: input, shape index: {}]   ;;  %s3105_s4 = inlined_call_operand.vmem [shape: f32[2,32,64], index: 4, kind: input, shape index: {}]   ;;  %s3106_s5 = inlined_call_operand.vmem [shape: f32[2,1,64], index: 5, kind: input, shape index: {}]   ;;  %s3107_s6 = inlined_call_operand.vmem [shape: f32[2,32,32], index: 6, kind: input, shape index: {}]   ;;  %s3108_s7 = inlined_call_operand.vmem [shape: f32[2,1,32], index: 7, kind: input, shape index: {}]   ;;  %s3109_s8 = inlined_call_operand.vmem [shape: f32[2,1,32], index: 8, kind: input, shape index: {}]   ;;  %s3110_s9 = inlined_call_operand.vmem [shape: f32[2,1,32], index: 9, kind: input, shape index: {}]   ;;  %s3111_s10 = inlined_call_operand.vmem [shape: f32[2,32,128], index: 10, kind: input, shape index: {}]   ;;  %s3112_s11 = inlined_call_operand.vmem [shape: f32[2,1,128], index: 11, kind: input, shape index: {}]   ;;  %s3113_s12 = inlined_call_operand.vmem [shape: f32[2,128,32], index: 12, kind: input, shape index: {}]   ;;  %s3114_s13 = inlined_call_operand.vmem [shape: f32[2,1,32], index: 13, kind: input, shape index: {}]   ;;  %s3115_s14 = inlined_call_operand.vmem [shape: f32[2,1,32], index: 14, kind: input, shape index: {}]   ;;  %s3116_s15 = inlined_call_operand.vmem [shape: f32[2,1,32], index: 15, kind: input, shape index: {}]   ;;  %s3117_s16 = inlined_call_operand.hbm [shape: f32[16,32], index: 16, kind: output, shape index: {}]  }
   0x1   :  { %3133 = sst [smem:[#allocation20_spill]] %s3101_s0 }
   0x2   :  { %3134 = sst [smem:[#allocation21_spill]] %s3102_s1 }
   0x3   :  { %3135 = sst [smem:[#allocation22_spill]] %s3103_s2 }
   0x4   :  { %3136 = sst [smem:[#allocation23_spill]] %s3104_s3 }
   0x5   :  { %3137 = sst [smem:[#allocation24_spill]] %s3105_s4 }
   0x6   :  { %3138 = sst [smem:[#allocation25_spill]] %s3107_s6 }
   0x7   :  { %3139 = sst [smem:[#allocation26_spill]] %s3110_s9 }
   0x8   :  { %3140 = sst [smem:[#allocation27_spill]] %s3111_s10 }
   0x9   :  { %3141 = sst [smem:[#allocation28_spill]] %s3115_s14 }
   0xa   :  { %3142 = sst [smem:[#allocation29_spill]] %s3116_s15 }
   0xb   :  { %3143 = sst [smem:[#allocation30_spill]] %s3117_s16 }
   0xc   :  { %21 = vsyncpa [#allocation4], 0 }
   0xd   :  { %23 = vsyncpa [#allocation4 + $0x1], 0  ;;  %s2711_s21 = smov 0   ;;  %s2713_s22 = smov 0  }
   0xe   :  { %s2715_s23 = smov 0   ;;  %s2717_s24 = smov 0  }
   0xf   :  { %s2719_s25 = smov 0   ;;  %s2721_s26 = smov 0  }
  0x10   :  { %s2723_s27 = smov 0   ;;  %s2725_s28 = smov 0  }
  0x11 LB: > { %3144 = sst [smem:[#allocation6_spill]] %s2583_s21  ;;  %s2191_s29 = sadd.s32 4294967295, %s2611_s28   ;;  %s2611_s28 = sphi %s2725_s28, %s29_s28   ;;  %s2607_s27 = sphi %s2723_s27, %s3196_s27   ;;  %s2603_s26 = sphi %s2721_s26, %s3195_s26   ;;  %s2599_s25 = sphi %s2719_s25, %s3194_s25   ;;  %s2595_s24 = sphi %s2717_s24, %s3193_s24   ;;  %s2591_s23 = sphi %s2715_s23, %s3192_s23   ;;  %s2587_s22 = sphi %s2713_s22, %s3191_s22   ;;  %s2583_s21 = sphi %s2711_s21, %s3190_s21  }
  0x12   : > { %3145 = sst [smem:[#allocation7_spill]] %s2587_s22  ;;  %s2192_s30 = sadd.s32 4294967294, %s2611_s28  }
  0x13   : > { %3146 = sst [smem:[#allocation8_spill]] %s2591_s23  ;;  %s38_s0 = sadd.s32 1, %s2603_s26 }
  0x14   : > { %3147 = sst [smem:[#allocation9_spill]] %s2595_s24  ;;  %p39_p0 = scmp.ge.s32.totalorder %s38_s0, 2 }
  0x15   : > { %3148 = sst [smem:[#allocation10_spill]] %s2599_s25  ;;  %s41_s17 = sadd.s32 1, %s2607_s27 }
  0x16   : > { %3149 = sst [smem:[#allocation11_spill]] %s2603_s26  ;;  %p474_p1 = scmp.ne.s32.totalorder %s2591_s23, %s2587_s22 }
  0x17   : > { %3150 = sst [smem:[#allocation12_spill]] %s2607_s27  ;;  %p475_p2 = scmp.eq.s32.totalorder %s2191_s29, 3 }
  0x18   : > { %3151 = sst [smem:[#allocation13_spill]] %s2611_s28  ;;  %s3198_s0 = smov (%p39_p0, %s38_s0), 0 }
  0x19   : > { %3152 = sst [smem:[#allocation14_spill]] %s3198_s0  ;;  %s3200_s17 = smov (!%p39_p0, %s41_s17), %s2607_s27 }
  0x1a   : > { %p2760_p3 = por %p475_p2, %p474_p1  ;;  %p480_p4 = scmp.ne.s32.totalorder %s2587_s22, %s2583_s21 }
  0x1b   : > { %p43_p5 = scmp.ge.s32.totalorder %s3200_s17, 2  ;;  %p481_p6 = scmp.eq.s32.totalorder %s2192_s30, 3 }
  0x1c   : > { %s3153_s18 = scalar_select %p2760_p3, 1, 0 }
  0x1d   : > { %p2195_p7 = scmp.ge.s32.totalorder %s2611_s28, 1  ;;  %p607_p8 = scmp.lt.s32.totalorder %s2611_s28, 5 }
  0x1e   : > { %3154 = sst [smem:[#allocation15_spill]] %s3153_s18  ;;  %s3202_s17 = smov (%p43_p5, %s3200_s17), 0 }
  0x1f   : > { %3155 = sst [smem:[#allocation16_spill]] %s3202_s17  ;;  %p2770_p9 = por %p481_p6, %p480_p4 }
  0x20   : > { %p608_p10 = pnand %p2195_p7, %p607_p8  ;;  %s461_s20 = ssub.s32 %s2607_s27, %s3202_s17 }
  0x21   : > { %s3156_s19 = scalar_select %p2770_p9, 1, 0 }
  0x22   : > { %s464_s29 = sadd.s32 1, %s2591_s23  ;;  %p462_p11 = scmp.eq.s32.totalorder %s461_s20, 0 }
  0x23   : > { %3157 = sst [smem:[#allocation17_spill]] %s3156_s19  ;;  %611 = sbr.rel (%p608_p10) target bundleno = 2453 (0x995), region = 84 }
  0x24   : > { %s2778_s0 = scalar_select %p462_p11, %s2591_s23, %s464_s29  }
  0x26   : > { %3158 = sst [smem:[#allocation18_spill]] %s2778_s0 }
  0x28   : > { %s3124_s30 = sand.u32 1, %s2587_s22   ;;  %p712_p12 = scmp.lt.s32.totalorder %s2599_s25, 1 }
  0x29   : > { %s2196_s26 = sshll.u32 %s3124_s30, 3  ;;  %p720_p13 = scmp.lt.s32.totalorder %s2595_s24, 1 }
  0x2a   : > { %s713_s21 = scalar_select %p712_p12, %s2599_s25, 1 }
  0x2b   : > { %s2787_s19 = scalar_select %p720_p13, %s2595_s24, 1 }
  0x2c   : > { %s2197_s20 = sshll.u32 %s713_s21, 3  ;;  %s3159_s27 = sld [smem:[#allocation20_spill]] }
  0x2d   : > { %s3160_s1 = sld [smem:[#allocation21_spill]]  ;;  %s2239_s16 = sshll.u32 %s2787_s19, 5 }
  0x2e   : > { %s3163_s2 = sld [smem:[#allocation22_spill]]  ;;  %s765_s17 = scalar_lea.vmem %s3114_s13, %s2787_s19 }
  0x2f   : > { %s3164_s4 = sld [smem:[#allocation24_spill]] }
  0x30   : > { %s3165_s6 = sld [smem:[#allocation25_spill]] }
  0x31   : > { %s3167_s10 = sld [smem:[#allocation27_spill]] }
  0x32   : > { %s715_s0 = scalar_lea.vmem %s3159_s27, %s2197_s20 }
  0x33   : > { %s2795_s28 = scalar_lea.vmem %s3160_s1, %s2197_s20  ;;  %s757_s20 = scalar_lea.vmem %s3112_s11, %s2787_s19 }
  0x34   : > { %3161 = sst [smem:[#allocation19_spill]] %s2795_s28  ;;  %s2805_s21 = scalar_lea.vmem %s3163_s2, %s2239_s16 }
  0x35   : > { %s2810_s27 = scalar_lea.vmem %s3164_s4, %s2239_s16  ;;  %s3168_s2 = sld [smem:[#allocation28_spill]] }
  0x36   : > { %s2819_s14 = scalar_lea.vmem %s3165_s6, %s2239_s16  ;;  %s2243_s6 = sshll.u32 %s2787_s19, 7 }
  0x37   : > { %s2836_s30 = scalar_lea.vmem %s3167_s10, %s2239_s16  ;;  %s2846_s15 = scalar_lea.vmem %s3113_s12, %s2243_s6 }
  0x38   : > { %s3169_s10 = sld [smem:[#allocation29_spill]]  ;;  %s2860_s1 = scalar_lea.vmem [#allocation3], %s2196_s26 }
  0x39   : > { %s3170_s28 = sld [smem:[#allocation9_spill]] }
  0x3b   : > { %s768_s3 = scalar_lea.vmem %s3168_s2, %s2787_s19 }
  0x3e   : > { %s771_s9 = scalar_lea.vmem %s3169_s10, %s2787_s19 }
  0x3f   : > { %p2209_p0 = scmp.ne.s32.totalorder %s3170_s28, 0 }
  0x41   : > { %775 = sbr.rel (%p2209_p0) target bundleno = 72 (0x48), region = 88 }
  0x46   : > { %v776_v0 = vld [vmem:[%s715_s0] sm:$0xff]  ;;  %vm777_vm0 = vcmask 261120  }
  0x47   : > { %778 = vst.msk [vmem:[%s2860_s1] sm:$0xff] %vm777_vm0, %v776_v0 }
  0x48 PF: > { %v784_v1 = vld [vmem:[%s2805_s21 + $0x18] sm:$0xff]  ;;  %v2613_v2 = vmov 0.0   ;;  %v783_v3 = vld [vmem:[%s2805_s21 + $0x10] sm:$0xff]  ;;  %vm2614_vm1 = vmmov 0   ;;  %v782_v4 = vld [vmem:[%s2805_s21 + $0x8] sm:$0xff]  ;;  %s3171_s2 = sld [smem:[#allocation19_spill]]  ;;  %s3176_s0 = scalar_lea.vmem %s3109_s8, %s2787_s19 }
  0x49   : > { %2297 = vmatprep.subr.mxu1 %v2613_v2  ;;  %2305 = vmatprep.mubr.msk.f32.mxu1 %vm2614_vm1, %v2613_v2  ;;  %v781_v5 = vld [vmem:[%s2805_s21] sm:$0xff]  ;;  %vm792_vm2 = vcmask 261120   ;;  %v869_v7 = vld [vmem:[%s2810_s27 + $0x18] sm:$0xff]  ;;  %v868_v8 = vld [vmem:[%s2810_s27 + $0x10] sm:$0xff]  ;;  %s3172_s10 = sld [smem:[#allocation23_spill]]  ;;  %vm951_vm3 = vcmask 64512  }
  0x4a   : > { %2298 = vmatpush3.msra.mxu1 %v784_v1  ;;  %2319 = vmatprep.subr.mxu0 %v2613_v2  ;;  %v867_v9 = vld [vmem:[%s2810_s27 + $0x8] sm:$0xff]  ;;  %v866_v10 = vld [vmem:[%s2810_s27] sm:$0xff]  ;;  %s3174_s27 = scalar_lea.vmem %s3106_s5, %s2787_s19  ;;  %s2615_s22 = smov 112   ;;  %vm1285_vm4 = vcmask 130112   ;;  %vm1456_vm5 = vcmask 195712   ;;  %vm1627_vm6 = vcmask 261312  }
  0x4b   : > { %2299 = vmatprep.subr.mxu1 %v2613_v2  ;;  %2321 = vmatprep.mubr.msk.f32.mxu0 %vm2614_vm1, %v2613_v2  ;;  %v2212_v15 = vld [vmem:[%s3174_s27] ss:$0 sm:$0xff]  ;;  %s2616_s18 = smov 120   ;;  %s2617_s25 = smov 104  }
  0x4c   : > { %2300 = vmatpush3.msra.mxu1 %v783_v3  ;;  %s2618_s24 = smov 96   ;;  %s2619_s29 = smov 80  }
  0x4d   : > { %2301 = vmatprep.subr.mxu1 %v2613_v2  ;;  %s2620_s16 = smov 72   ;;  %s2621_s23 = smov 88  }
  0x4e   : > { %2302 = vmatpush3.msra.mxu1 %v782_v4  ;;  %v2877_v6 = vld [vmem:[%s2860_s1] sm:$0xff]  ;;  %v780_v11 = vld [vmem:[%s3171_s2] sm:$0xff]  ;;  %s2622_s28 = smov 8   ;;  %s2623_s2 = smov 16  }
  0x4f   : > { %2303 = vmatprep.subr.mxu1 %v2613_v2  ;;  %s3173_s26 = scalar_lea.vmem %s3172_s10, %s2787_s19  ;;  %s2624_s4 = smov 24  }
  0x50   : > { %2304 = vmatpush3.msra.mxu1 %v781_v5  ;;  %v2210_v14 = vld [vmem:[%s3173_s26] ss:$0 sm:$0xff]  ;;  %s3175_s10 = scalar_lea.vmem %s3108_s7, %s2787_s19  ;;  %s3184_s21 = sld [smem:[#allocation30_spill]] }
  0x51   : > { %2306 = vmatmul.mubr.msk.f32.vlgmr.msra.gmra.mxu1 %vm792_vm2, %v2877_v6  ;;  %2308 = vmatprep.subr.mxu1 %v2613_v2 }
  0x52   : > { %2309 = vmatpush3.msra.mxu1 %v869_v7  ;;  %2316 = vmatprep.mubr.msk.f32.mxu1 %vm2614_vm1, %v2613_v2 }
  0x53   : > { %2310 = vmatprep.subr.mxu1 %v2613_v2 }
  0x54   : > { %2311 = vmatpush3.msra.mxu1 %v868_v8 }
  0x55   : > { %2312 = vmatprep.subr.mxu1 %v2613_v2 }
  0x56   : > { %2313 = vmatpush3.msra.mxu1 %v867_v9 }
  0x57   : > { %2314 = vmatprep.subr.mxu1 %v2613_v2 }
  0x58   : > { %2315 = vmatpush3.msra.mxu1 %v866_v10 }
  0x59   : > { %2317 = vmatmul.mubr.msk.f32.vlgmr.msra.gmra.mxu1 %vm792_vm2, %v780_v11  ;;  %2324 = vmatprep.subr.mxu1 %v2613_v2 }
  0x5a   : > { %2326 = vmatprep.mubr.msk.f32.mxu1 %vm2614_vm1, %v2613_v2 }
 0x111   : > { %v862_v12 = vpop.f32.mrf.mxu1 }
 0x112   : > { %v863_v17 = vadd.f32 %v2210_v14, %v862_v12 }
 0x113   : > { %v2307_v13 = vpop.f32.mrf.mxu1 }
 0x114   : > { %v950_v20 = vmul.f32 0.35355338, %v863_v17  ;;  %v1631_v17 = vld [vmem:[%s2819_s14 + $0x8] sm:$0xff] }
 0x119   : > { %v946_v16 = vpop.f32.mrf.mxu1 }
 0x11a   : > { %v2907_v18 = vadd.f32 %v2212_v15, %v946_v16  ;;  %v1633_v15 = vld [vmem:[%s2819_s14 + $0x18] sm:$0xff]  ;;  %v1632_v16 = vld [vmem:[%s2819_s14 + $0x10] sm:$0xff] }
 0x11b   : > { %v2318_v19 = vpop.f32.mrf.mxu1 }
 0x11c   : > { %1289 = vrot.lane.b32.xlu1 %v2907_v18, %s2615_s22  ;;  %1118 = vrot.lane.b32.xlu0 %v2907_v18, %s2616_s18  ;;  %v1630_v19 = vld [vmem:[%s2819_s14] sm:$0xff] }
 0x11d   : > { %2320 = vmatpush3.xpose.msk.msra.mxu0 %vm951_vm3, %v2907_v18 }
 0x11e   : > { %2329 = vmatprep.subr.mxu0 %v2613_v2 }
 0x120   : > { %2322 = vmatmul.mubr.msk.f32.vlgmr.msra.gmra.mxu0 %vm951_vm3, %v950_v20  ;;  %1287 = vrot.lane.b32.xlu1 %v950_v20, %s2615_s22  ;;  %s3177_s22 = sld [smem:[#allocation26_spill]] }
 0x121   : > { %1116 = vrot.lane.b32.xlu0 %v950_v20, %s2616_s18  ;;  %2331 = vmatprep.mubr.msk.f32.mxu0 %vm2614_vm1, %v2613_v2 }
 0x124   : > { %1458 = vrot.lane.b32.xlu1 %v950_v20, %s2617_s25 }
 0x125   : > { %1460 = vrot.lane.b32.xlu0 %v2907_v18, %s2617_s25 }
 0x126   : > { %s3178_s18 = scalar_lea.vmem %s3177_s22, %s2787_s19  ;;  %s2625_s19 = smov [#allocation3]  }
 0x18e   : > { %v1119_v21 = vpop.permute.xlu0 %1118  ;;  %v1290_v22 = vpop.permute.xlu1 %1289 }
 0x18f   : > { %2330 = vmatpush3.xpose.msk.msra.mxu0 %vm951_vm3, %v1119_v21 }
 0x190   : > { %2339 = vmatprep.subr.mxu0 %v2613_v2 }
 0x192   : > { %v1288_v24 = vpop.permute.xlu1 %1287 }
 0x193   : > { %v1117_v23 = vpop.permute.xlu0 %1116 }
 0x194   : > { %2332 = vmatmul.mubr.msk.f32.vlgmr.msra.gmra.mxu0 %vm951_vm3, %v1117_v23 }
 0x195   : > { %2340 = vmatpush3.xpose.msk.msra.mxu0 %vm951_vm3, %v1290_v22  ;;  %2341 = vmatprep.mubr.msk.f32.mxu0 %vm2614_vm1, %v2613_v2 }
 0x196   : > { %2349 = vmatprep.subr.mxu0 %v2613_v2  ;;  %v1459_v26 = vpop.permute.xlu1 %1458 }
 0x197   : > { %v1461_v25 = vpop.permute.xlu0 %1460 }
 0x198   : > { %2342 = vmatmul.mubr.msk.f32.vlgmr.msra.gmra.mxu0 %vm951_vm3, %v1288_v24 }
 0x199   : > { %2350 = vmatpush3.xpose.msk.msra.mxu0 %vm951_vm3, %v1461_v25  ;;  %2351 = vmatprep.mubr.msk.f32.mxu0 %vm2614_vm1, %v2613_v2 }
 0x19a   : > { %2381 = vmatprep.subr.mxu0 %v2613_v2 }
 0x19c   : > { %2352 = vmatmul.mubr.msk.f32.vlgmr.msra.gmra.mxu0 %vm951_vm3, %v1459_v26 }
 0x19d   : > { %2413 = vmatprep.mubr.msk.f32.mxu0 %vm2614_vm1, %v2613_v2 }
 0x1e0   : > { %v1024_v27 = vpop.f32.mrf.mxu0 }
 0x1e1   : > { %v1028_v28 = vsel %vm951_vm3, %v1024_v27, -inf }
 0x1e2   : > { %1029 = vmax.xlane.f32.xlu0 %v1028_v28  ;;  %v2323_v29 = vpop.f32.mrf.mxu0 }
 0x1e3   : > { %v2226_v29 = vld [vmem:[%s3175_s10] ss:$0 sm:$0xff] }
 0x254   : > { %v1190_v30 = vpop.f32.mrf.mxu0 }
 0x255   : > { %v1194_v31 = vsel %vm951_vm3, %v1190_v30, -inf }
 0x256   : > { %1195 = vmax.xlane.f32.xlu1 %v1194_v31  ;;  %v2333_v32 = vpop.f32.mrf.mxu0 }
 0x258   : > { %v1361_v33 = vpop.f32.mrf.mxu0 }
 0x259   : > { %v1365_v34 = vsel %vm951_vm3, %v1361_v33, -inf }
 0x25a   : > { %1366 = vmax.xlane.f32.xlu0 %v1365_v34  ;;  %v2343_v35 = vpop.f32.mrf.mxu0 }
 0x25c   : > { %v1532_v36 = vpop.f32.mrf.mxu0 }
 0x25d   : > { %v1536_v37 = vsel %vm951_vm3, %v1532_v36, -inf }
 0x25e   : > { %1537 = vmax.xlane.f32.xlu0 %v1536_v37  ;;  %v2353_v38 = vpop.f32.mrf.mxu0 }
 0x267   : > { %1039 = vrot.lane.b32.xlu1 %v2907_v18, %s2618_s24 }
 0x26b   : > { %v1030_v39 = vpop.xlane.xlu0 %1029 }
 0x26c   : > { %v1031_v40 = vsub.f32 %v1024_v27, %v1030_v39 }
 0x26e   : > { %v1032_v41 = vmul.f32 1.442695, %v1031_v40  ;;  %v1748_v40 = vld [vmem:[%s2836_s30 + $0x18] sm:$0xff] }
 0x270   : > { %2499 = vpow2.f32 %v1032_v41  ;;  %v1747_v41 = vld [vmem:[%s2836_s30 + $0x10] sm:$0xff] }
 0x27d   : > { %v2500_v42 = vpop.eup %2499 }
 0x27e   : > { %v1034_v43 = vsel %vm951_vm3, %v2500_v42, 0.0 }
 0x28b   : > { %1035 = vadd.xlane.f32.xlu1 %v1034_v43  ;;  %v1845_v43 = vld [vmem:[%s2846_s15 + $0x78] sm:$0xff] }
 0x28c   : > { %2382 = vmatpush3.msra.mxu0 %v1845_v43 }
 0x28d   : > { %2383 = vmatprep.subr.mxu0 %v2613_v2 }
 0x2df   : > { %v1196_v44 = vpop.xlane.xlu1 %1195 }
 0x2e0   : > { %v1197_v45 = vsub.f32 %v1190_v30, %v1196_v44  ;;  %v1844_v44 = vld [vmem:[%s2846_s15 + $0x70] sm:$0xff] }
 0x2e1   : > { %2384 = vmatpush3.msra.mxu0 %v1844_v44 }
 0x2e2   : > { %v1198_v46 = vmul.f32 1.442695, %v1197_v45  ;;  %v1843_v45 = vld [vmem:[%s2846_s15 + $0x68] sm:$0xff]  ;;  %2385 = vmatprep.subr.mxu0 %v2613_v2 }
 0x2e3   : > { %v1040_v47 = vpop.permute.xlu1 %1039  ;;  %v1367_v48 = vpop.xlane.xlu0 %1366  ;;  %2386 = vmatpush3.msra.mxu0 %v1843_v45 }
 0x2e4   : > { %2501 = vpow2.f32 %v1198_v46  ;;  %v1368_v49 = vsub.f32 %v1361_v33, %v1367_v48  ;;  %2325 = vmatpush3.msra.mxu1 %v1040_v47  ;;  %v1842_v46 = vld [vmem:[%s2846_s15 + $0x60] sm:$0xff]  ;;  %2387 = vmatprep.subr.mxu0 %v2613_v2  ;;  %v1841_v47 = vld [vmem:[%s2846_s15 + $0x58] sm:$0xff]  ;;  %v1840_v48 = vld [vmem:[%s2846_s15 + $0x50] sm:$0xff] }
 0x2e5   : > { %2334 = vmatprep.subr.mxu1 %v2613_v2  ;;  %2388 = vmatpush3.msra.mxu0 %v1842_v46 }
 0x2e6   : > { %v1369_v50 = vmul.f32 1.442695, %v1368_v49  ;;  %2389 = vmatprep.subr.mxu0 %v2613_v2  ;;  %v1839_v49 = vld [vmem:[%s2846_s15 + $0x48] sm:$0xff] }
 0x2e7   : > { %v1538_v51 = vpop.xlane.xlu0 %1537  ;;  %2390 = vmatpush3.msra.mxu0 %v1841_v47 }
 0x2e8   : > { %2503 = vpow2.f32 %v1369_v50  ;;  %v1539_v52 = vsub.f32 %v1532_v36, %v1538_v51  ;;  %2391 = vmatprep.subr.mxu0 %v2613_v2  ;;  %v1838_v50 = vld [vmem:[%s2846_s15 + $0x40] sm:$0xff]  ;;  %v1837_v51 = vld [vmem:[%s2846_s15 + $0x38] sm:$0xff] }
 0x2e9   : > { %2392 = vmatpush3.msra.mxu0 %v1840_v48 }
 0x2ea   : > { %v1540_v53 = vmul.f32 1.442695, %v1539_v52  ;;  %2393 = vmatprep.subr.mxu0 %v2613_v2  ;;  %v1836_v52 = vld [vmem:[%s2846_s15 + $0x30] sm:$0xff] }
 0x2eb   : > { %2394 = vmatpush3.msra.mxu0 %v1839_v49 }
 0x2ec   : > { %2505 = vpow2.f32 %v1540_v53  ;;  %2395 = vmatprep.subr.mxu0 %v2613_v2  ;;  %v1835_v53 = vld [vmem:[%s2846_s15 + $0x28] sm:$0xff] }
 0x2ed   : > { %2396 = vmatpush3.msra.mxu0 %v1838_v50 }
 0x2ee   : > { %2397 = vmatprep.subr.mxu0 %v2613_v2 }
 0x2ef   : > { %2398 = vmatpush3.msra.mxu0 %v1837_v51 }
 0x2f0   : > { %2399 = vmatprep.subr.mxu0 %v2613_v2 }
 0x2f1   : > { %v2502_v54 = vpop.eup %2501  ;;  %2400 = vmatpush3.msra.mxu0 %v1836_v52 }
 0x2f2   : > { %v1200_v55 = vsel %vm951_vm3, %v2502_v54, 0.0  ;;  %2401 = vmatprep.subr.mxu0 %v2613_v2 }
 0x2f3   : > { %1201 = vadd.xlane.f32.xlu0 %v1200_v55  ;;  %2402 = vmatpush3.msra.mxu0 %v1835_v53  ;;  %v1833_v55 = vld [vmem:[%s2846_s15 + $0x18] sm:$0xff] }
 0x2f4   : > { %2403 = vmatprep.subr.mxu0 %v2613_v2 }
 0x2f5   : > { %v2504_v56 = vpop.eup %2503 }
 0x2f6   : > { %v1371_v57 = vsel %vm951_vm3, %v2504_v56, 0.0 }
 0x2f7   : > { %1372 = vadd.xlane.f32.xlu1 %v1371_v57 }
 0x2f9   : > { %v2506_v58 = vpop.eup %2505 }
 0x2fa   : > { %v1542_v59 = vsel %vm951_vm3, %v2506_v58, 0.0 }
 0x2fb   : > { %1543 = vadd.xlane.f32.xlu0 %v1542_v59 }
 0x308   : > { %1376 = vrot.lane.b32.xlu1 %v2907_v18, %s2619_s29 }
 0x30c   : > { %1547 = vrot.lane.b32.xlu1 %v2907_v18, %s2620_s16 }
 0x311   : > { %1205 = vrot.lane.b32.xlu0 %v2907_v18, %s2621_s23 }
 0x314   : > { %v1036_v60 = vpop.xlane.xlu1 %1035 }
 0x315   : > { %2507 = vrcp.f32 %v1036_v60  ;;  %v2228_v60 = vld [vmem:[%s3176_s0] ss:$0 sm:$0xff] }
 0x322   : > { %v2508_v61 = vpop.eup %2507 }
 0x323   : > { %v1038_v62 = vmul.f32 %v2508_v61, %v2500_v42  ;;  %v1745_v42 = vld [vmem:[%s2836_s30] sm:$0xff] }
 0x325   : > { %2327 = vmatmul.mubr.msk.f32.vlgmr.msra.gmra.mxu1 %vm951_vm3, %v1038_v62  ;;  %v2229_v62 = vld [vmem:[%s3178_s18] ss:$0 sm:$0xff]  ;;  %s3185_s18 = smov %s3184_s21 }
 0x326   : > { %2336 = vmatprep.mubr.msk.f32.mxu1 %vm2614_vm1, %v2613_v2 }
 0x37c   : > { %v1202_v63 = vpop.xlane.xlu0 %1201 }
 0x37d   : > { %2509 = vrcp.f32 %v1202_v63 }
 0x380   : > { %v1373_v0 = vpop.xlane.xlu1 %1372 }
 0x381   : > { %2511 = vrcp.f32 %v1373_v0 }
 0x384   : > { %v1544_v1 = vpop.xlane.xlu0 %1543  ;;  %v1377_v5 = vpop.permute.xlu1 %1376 }
 0x385   : > { %2513 = vrcp.f32 %v1544_v1  ;;  %v1832_v1 = vld [vmem:[%s2846_s15 + $0x10] sm:$0xff] }
 0x388   : > { %v1206_v3 = vpop.permute.xlu0 %1205  ;;  %v1548_v10 = vpop.permute.xlu1 %1547 }
 0x389   : > { %2335 = vmatpush3.msra.mxu1 %v1206_v3  ;;  %v1831_v3 = vld [vmem:[%s2846_s15 + $0x8] sm:$0xff] }
 0x38a   : > { %v2510_v4 = vpop.eup %2509  ;;  %2344 = vmatprep.subr.mxu1 %v2613_v2 }
 0x38b   : > { %v1204_v7 = vmul.f32 %v2510_v4, %v2502_v54  ;;  %v1834_v54 = vld [vmem:[%s2846_s15 + $0x20] sm:$0xff] }
 0x38c   : > { %2404 = vmatpush3.msra.mxu0 %v1834_v54  ;;  %v1830_v4 = vld [vmem:[%s2846_s15] sm:$0xff]  ;;  %s3179_s15 = sld [smem:[#allocation10_spill]] }
 0x38d   : > { %2337 = vmatmul.mubr.msk.f32.vlgmr.msra.gmra.mxu1 %vm951_vm3, %v1204_v7  ;;  %2405 = vmatprep.subr.mxu0 %v2613_v2 }
 0x38e   : > { %v2512_v8 = vpop.eup %2511  ;;  %2345 = vmatpush3.msra.mxu1 %v1377_v5  ;;  %2346 = vmatprep.mubr.msk.f32.mxu1 %vm2614_vm1, %v2613_v2  ;;  %v2230_v5 = vld [vmem:[%s757_s20] ss:$0 sm:$0xff]  ;;  %s3180_s20 = sld [smem:[#allocation7_spill]] }
 0x38f   : > { %2354 = vmatprep.subr.mxu1 %v2613_v2  ;;  %v1375_v9 = vmul.f32 %v2512_v8, %v2504_v56  ;;  %2406 = vmatpush3.msra.mxu0 %v1833_v55 }
 0x390   : > { %2407 = vmatprep.subr.mxu0 %v2613_v2 }
 0x391   : > { %2347 = vmatmul.mubr.msk.f32.vlgmr.msra.gmra.mxu1 %vm951_vm3, %v1375_v9  ;;  %2408 = vmatpush3.msra.mxu0 %v1832_v1 }
 0x392   : > { %v2514_v11 = vpop.eup %2513  ;;  %2355 = vmatpush3.msra.mxu1 %v1548_v10  ;;  %2356 = vmatprep.mubr.msk.f32.mxu1 %vm2614_vm1, %v2613_v2  ;;  %s2236_s10 = sshll.u32 %s3179_s15, 7 }
 0x393   : > { %v1546_v12 = vmul.f32 %v2514_v11, %v2506_v58  ;;  %2359 = vmatprep.subr.mxu1 %v2613_v2  ;;  %2409 = vmatprep.subr.mxu0 %v2613_v2  ;;  %v2232_v11 = vld [vmem:[%s765_s17] ss:$0 sm:$0xff]  ;;  %s1966_s27 = scalar_lea.hbm %s3184_s21, %s2236_s10 }
 0x394   : > { %2410 = vmatpush3.msra.mxu0 %v1831_v3  ;;  %s3186_s22 = sand.u32 1, %s3180_s20  }
 0x395   : > { %2357 = vmatmul.mubr.msk.f32.vlgmr.msra.gmra.mxu1 %vm951_vm3, %v1546_v12  ;;  %2411 = vmatprep.subr.mxu0 %v2613_v2  ;;  %s1955_s25 = scalar_lea.sflag [#allocation4], %s3186_s22 }
 0x396   : > { %2367 = vmatprep.mubr.msk.f32.mxu1 %vm2614_vm1, %v2613_v2  ;;  %2360 = vmatpush3.msra.mxu1 %v1633_v15 }
 0x397   : > { %2361 = vmatprep.subr.mxu1 %v2613_v2  ;;  %2412 = vmatpush3.msra.mxu0 %v1830_v4 }
 0x398   : > { %2362 = vmatpush3.msra.mxu1 %v1632_v16 }
 0x399   : > { %2363 = vmatprep.subr.mxu1 %v2613_v2 }
 0x39a   : > { %2364 = vmatpush3.msra.mxu1 %v1631_v17 }
 0x39b   : > { %2365 = vmatprep.subr.mxu1 %v2613_v2 }
 0x39c   : > { %2366 = vmatpush3.msra.mxu1 %v1630_v19 }
 0x39d   : > { %2370 = vmatprep.subr.mxu1 %v2613_v2 }
 0x3e5   : > { %v1111_v13 = vpop.f32.mrf.mxu1 }
 0x3e6   : > { %1115 = vst.msk [vmem:[#allocation2] sm:$0xff] %vm951_vm3, %v1111_v13 }
 0x3e7   : > { %v2328_v14 = vpop.f32.mrf.mxu1 }
 0x44d   : > { %v1277_v18 = vpop.f32.mrf.mxu1 }
 0x44e   : > { %1282 = vrot.lane.b32.xlu0 %v1277_v18, %s2622_s28 }
 0x44f   : > { %v2338_v20 = vpop.f32.mrf.mxu1 }
 0x451   : > { %v1448_v21 = vpop.f32.mrf.mxu1 }
 0x452   : > { %1453 = vrot.lane.b32.xlu1 %v1448_v21, %s2623_s2 }
 0x453   : > { %v2348_v22 = vpop.f32.mrf.mxu1 }
 0x455   : > { %v1619_v23 = vpop.f32.mrf.mxu1 }
 0x456   : > { %1624 = vrot.lane.b32.xlu0 %v1619_v23, %s2624_s4 }
 0x457   : > { %v2358_v24 = vpop.f32.mrf.mxu1 }
 0x4c0   : > { %v1283_v25 = vpop.permute.xlu0 %1282 }
 0x4c1   : > { %1286 = vst.msk [vmem:[#allocation2] sm:$0xff] %vm1285_vm4, %v1283_v25  ;;  %v2233_v25 = vld [vmem:[%s768_s3] ss:$0 sm:$0xff] }
 0x4c4   : > { %v1454_v26 = vpop.permute.xlu1 %1453 }
 0x4c5   : > { %1457 = vst.msk [vmem:[#allocation2] sm:$0xff] %vm1456_vm5, %v1454_v26 }
 0x4c8   : > { %v1625_v27 = vpop.permute.xlu0 %1624 }
 0x4c9   : > { %1628 = vst.msk [vmem:[#allocation2] sm:$0xff] %vm1627_vm6, %v1625_v27  ;;  %v2234_v27 = vld [vmem:[%s771_s9] ss:$0 sm:$0xff]  ;;  %s2523_s9 = sshll.u32 %s2625_s19, 4  ;;  %s2524_s9 = int_to_ptr.vmem [resolvable:$false] %s2523_s9 }
 0x4ca   : > { %s2525_s24 = scalar_lea.vmem %s2524_s9, 256 }
 0x4d0   : > { %v1629_v28 = vld [vmem:[#allocation2] sm:$0xff] }
 0x4d1   : > { %2368 = vmatmul.mubr.msk.f32.vlgmr.msra.gmra.mxu1 %vm792_vm2, %v1629_v28 }
 0x4d2   : > { %2378 = vmatprep.mubr.msk.f32.mxu1 %vm2614_vm1, %v2613_v2  ;;  %2371 = vmatpush3.msra.mxu1 %v1748_v40 }
 0x4d3   : > { %2372 = vmatprep.subr.mxu1 %v2613_v2 }
 0x4d4   : > { %2373 = vmatpush3.msra.mxu1 %v1747_v41 }
 0x4d5   : > { %2374 = vmatprep.subr.mxu1 %v2613_v2 }
 0x591   : > { %v1710_v30 = vpop.f32.mrf.mxu1 }
 0x592   : > { %v1711_v31 = vadd.f32 %v2226_v29, %v1710_v30 }
 0x593   : > { %v2369_v32 = vpop.f32.mrf.mxu1 }
 0x594   : > { %v1714_v33 = vadd.f32 %v1711_v31, %v2877_v6  ;;  %v1746_v6 = vld [vmem:[%s2836_s30 + $0x8] sm:$0xff]  ;;  %s1968_s30 = sshll.u32 %s2860_s1, 4  ;;  %s1969_s30 = int_to_ptr.vmem [resolvable:$true] %s1968_s30 }
 0x595   : > { %2375 = vmatpush3.msra.mxu1 %v1746_v6  ;;  %s2519_s3 = scalar_lea.vmem %s1969_s30, 128  ;;  %p2526_p5 = scmp.lt.s32.totalorder %s1969_s30, %s2524_s9 }
 0x596   : > { %v1715_v34 = vsel %vm792_vm2, %v1714_v33, 0.0  ;;  %2376 = vmatprep.subr.mxu1 %v2613_v2  ;;  %p2520_p1 = scmp.ne.s32.totalorder %s1969_s30, %s2519_s3  ;;  %p2527_p6 = scmp.lt.s32.totalorder %s2525_s24, %s2519_s3 }
 0x597   : > { %1716 = vadd.xlane.f32.xlu1 %v1715_v34  ;;  %2377 = vmatpush3.msra.mxu1 %v1745_v42 }
 0x598   : > { %p2521_p2 = pnand %p2520_p1, %p2760_p3  ;;  %p2528_p7 = por %p2527_p6, %p2526_p5 }
 0x59a   : > { %p2522_p4 = pneg %p2521_p2 }
 0x59c   : > { %p2529_p8 = pnand %p2528_p7, %p2522_p4 }
 0x620   : > { %v1717_v35 = vpop.xlane.xlu1 %1716 }
 0x621   : > { %v1719_v36 = vmul.f32 0.03125, %v1717_v35 }
 0x623   : > { %v1720_v37 = vsub.f32 %v1714_v33, %v1719_v36 }
 0x625   : > { %v1721_v38 = vmul.f32 %v1720_v37, %v1720_v37 }
 0x627   : > { %v1722_v39 = vsel %vm792_vm2, %v1721_v38, 0.0 }
 0x628   : > { %1723 = vadd.xlane.f32.xlu0 %v1722_v39 }
 0x6b1   : > { %v1724_v56 = vpop.xlane.xlu0 %1723 }
 0x6b2   : > { %v1725_v57 = vmul.f32 0.03125, %v1724_v56 }
 0x6b4   : > { %v1726_v58 = vadd.f32 1e-05, %v1725_v57 }
 0x6b6   : > { %2515 = vrsqrt.f32 %v1726_v58 }
 0x6c3   : > { %v2516_v59 = vpop.eup %2515 }
 0x6c4   : > { %v1728_v61 = vmul.f32 %v2516_v59, %v1720_v37 }
 0x6c6   : > { %v1736_v63 = vmul.f32 %v2228_v60, %v1728_v61 }
 0x6c8   : > { %v1744_v0 = vadd.f32 %v2229_v62, %v1736_v63 }
 0x6ca   : > { %2379 = vmatmul.mubr.msk.f32.vlgmr.msra.gmra.mxu1 %vm792_vm2, %v1744_v0 }
 0x78a   : > { %v1825_v7 = vpop.f32.mrf.mxu1 }
 0x78b   : > { %v1826_v8 = vadd.f32 %v2230_v5, %v1825_v7 }
 0x78c   : > { %v2380_v9 = vpop.f32.mrf.mxu1 }
 0x78d   : > { %v1829_v10 = vmax.f32 %v1826_v8, 0.0 }
 0x78f   : > { %2414 = vmatmul.mubr.f32.vlgmr.msra.gmra.mxu0 %v1829_v10 }
 0x84f   : > { %v1919_v12 = vpop.f32.mrf.mxu0 }
 0x850   : > { %v1920_v13 = vadd.f32 %v2232_v11, %v1919_v12 }
 0x851   : > { %v2415_v2 = vpop.f32.mrf.mxu0 }
 0x852   : > { %v1923_v14 = vadd.f32 %v1920_v13, %v1744_v0 }
 0x854   : > { %v1924_v15 = vsel %vm792_vm2, %v1923_v14, 0.0 }
 0x855   : > { %1925 = vadd.xlane.f32.xlu0 %v1924_v15 }
 0x8de   : > { %v1926_v16 = vpop.xlane.xlu0 %1925 }
 0x8df   : > { %v1927_v17 = vmul.f32 0.03125, %v1926_v16 }
 0x8e1   : > { %v1928_v18 = vsub.f32 %v1923_v14, %v1927_v17 }
 0x8e3   : > { %v1929_v19 = vmul.f32 %v1928_v18, %v1928_v18 }
 0x8e5   : > { %v1930_v20 = vsel %vm792_vm2, %v1929_v19, 0.0 }
 0x8e6   : > { %1931 = vadd.xlane.f32.xlu1 %v1930_v20 }
 0x96f   : > { %v1932_v21 = vpop.xlane.xlu1 %1931 }
 0x970   : > { %v1933_v22 = vmul.f32 0.03125, %v1932_v21 }
 0x972   : > { %v1934_v23 = vadd.f32 1e-05, %v1933_v22 }
 0x974   : > { %2517 = vrsqrt.f32 %v1934_v23 }
 0x981   : > { %v2518_v24 = vpop.eup %2517 }
 0x982   : > { %v1936_v26 = vmul.f32 %v2518_v24, %v1928_v18 }
 0x984   : > { %v1944_v28 = vmul.f32 %v2233_v25, %v1936_v26 }
 0x986   : > { %v1952_v29 = vadd.f32 %v2234_v27, %v1944_v28 }
 0x988   : > { %1953 = vst.msk [vmem:[%s2860_s1] sm:$0xff] %vm792_vm2, %v1952_v29 }
 0x989   : > { %2532 = shalt.err (!%p2529_p8)
}
 0x98a   : > { %s2533_s29 = scalar_lea.hbm %s1966_s27, 128  ;;  %s2537_s15 = scalar_lea.hbm %s3185_s18, 256 }
 0x98b   : > { %p2534_p10 = scmp.ne.s32.totalorder %s1966_s27, %s2533_s29  ;;  %p2538_p13 = scmp.lt.s32.totalorder %s1966_s27, %s3185_s18 }
 0x98c   : > { %p2539_p0 = scmp.lt.s32.totalorder %s2537_s15, %s2533_s29 }
 0x98d   : > { %p2535_p11 = pnand %p2534_p10, %p2760_p3 }
 0x98e   : > { %p2540_p1 = por %p2539_p0, %p2538_p13 }
 0x98f   : > { %p2536_p12 = pneg %p2535_p11 }
 0x991   : > { %p2541_p2 = pnand %p2540_p1, %p2536_p12 }
 0x993   : > { %2544 = shalt.err (!%p2541_p2)
}
 0x994   : > { %2416 = dma.vmem_to_hbm [thread:$0]  (%p2760_p3), %s1969_s30, 128, %s1966_s27, %s1955_s25  }
 0x995 PF: > { %s3187_s28 = sld [smem:[#allocation13_spill]] }
 0x996   : > { %s3188_s2 = sld [smem:[#allocation6_spill]] }
 0x99b   : > { %p2422_p4 = scmp.ge.s32.totalorder %s3187_s28, 2 }
 0x99c   : > { %s1980_s14 = sand.u32 1, %s3188_s2  }
 0x99d   : > { %p2419_p5 = pnand %p2422_p4, %p2770_p9  ;;  %s1981_s6 = scalar_lea.sflag [#allocation4], %s1980_s14 }
 0x99f   : > { %p2420_p6 = pneg %p2419_p5 }
 0x9a1   : > { %2578 = dma.done.wait (%p2420_p6), %s1981_s6, 128  }
 0x9a2   : > { %2580 = vsyncadd (%p2420_p6), %s1981_s6, 4294967168  ;;  %s29_s28 = sadd.s32 1, %s3187_s28   ;;  %s3190_s21 = sld [smem:[#allocation7_spill]] }
 0x9a3   : > { %p26_p7 = scmp.ge.s32.totalorder %s29_s28, 6   ;;  %s3191_s22 = sld [smem:[#allocation8_spill]] }
 0x9a4   : > { %s3192_s23 = sld [smem:[#allocation18_spill]] }
 0x9a5   : > { %s3193_s24 = sld [smem:[#allocation11_spill]]  ;;  %28 = sbr.rel (!%p26_p7) target bundleno = 17 (0x11), region = 168 }
 0x9a6   : > { %s3194_s25 = sld [smem:[#allocation12_spill]] }
 0x9a7   : > { %s3195_s26 = sld [smem:[#allocation14_spill]] }
 0x9a8   : > { %s3196_s27 = sld [smem:[#allocation16_spill]] }
 0x9aa   :  { %1986 = vsyncpa [#allocation4], 1 }
 0x9ab   :  { %1988 = vsyncpa [#allocation4 + $0x1], 1 }

</bundles_post_ra>
